<compile_context>
chip_gen: v6e
topology: v6e:2x2x1
jax: 0.10.0
libtpu: 0.0.40
codegen_flags: <defaults>
</compile_context>

<pallas_src>
import functools

import jax
import jax.numpy as jnp
import numpy as np
from jax.experimental import pallas as pl
from jax.experimental.pallas import tpu as pltpu

LANE = 128            # vreg lane width
SUB = 8               # f32 sublane tiling
MAX_TILE_ROWS = 2048  # (2048, 128) f32 = 1 MiB per input block


def _round_up(x, m):
    return (x + m - 1) // m * m


# --------------------------------------------------------------------------
# Kernel 1: per-block partial sums of |x - r| over a lane-dense (rows, 128)
# view of the flattened tensors.  One (1, 1, 1) partial sum per grid step;
# no cross-step state -> grid axis is fully parallel.
# --------------------------------------------------------------------------
def _abs_diff_partial_kernel(x_ref, r_ref, out_ref, *, tile_rows, valid_rows,
                             needs_mask):
    diff = jnp.abs(x_ref[...] - r_ref[...])
    if needs_mask:
        # Only the final block can be partial; for full blocks the predicate
        # is all-true, so masking unconditionally stays correct (and is cheap
        # VPU work hidden under the HBM DMA).
        row = (jax.lax.broadcasted_iota(jnp.int32, diff.shape, 0)
               + pl.program_id(0) * tile_rows)
        diff = jnp.where(row < valid_rows, diff, 0.0)
    out_ref[...] = jnp.reshape(jnp.sum(diff), (1, 1, 1))


def rec_abs_sum(inputs, reconstructions, max_tile_rows=MAX_TILE_ROWS):
    """sum(|inputs - reconstructions|) over all elements, via Pallas."""
    x = inputs.astype(jnp.float32).reshape(-1)
    r = reconstructions.astype(jnp.float32).reshape(-1)
    numel = x.shape[0]

    lane_pad = (-numel) % LANE
    if lane_pad:
        # TODO(synk): rare for NCHW image tensors (numel % 128 != 0); this pad
        # costs one extra HBM pass.  Padded zeros contribute |0 - 0| = 0.
        x = jnp.pad(x, (0, lane_pad))
        r = jnp.pad(r, (0, lane_pad))

    rows = x.shape[0] // LANE
    x2 = x.reshape(rows, LANE)
    r2 = r.reshape(rows, LANE)

    tile_rows = min(max_tile_rows, _round_up(rows, SUB))
    nblocks = pl.cdiv(rows, tile_rows)
    needs_mask = (rows % tile_rows) != 0

    kernel = functools.partial(_abs_diff_partial_kernel,
                               tile_rows=tile_rows, valid_rows=rows,
                               needs_mask=needs_mask)

    partials = pl.pallas_call(
        kernel,
        out_shape=jax.ShapeDtypeStruct((nblocks, 1, 1), jnp.float32),
        grid_spec=pltpu.PrefetchScalarGridSpec(
            num_scalar_prefetch=0,
            grid=(nblocks,),
            in_specs=[pl.BlockSpec((tile_rows, LANE), lambda i: (i, 0)),
                      pl.BlockSpec((tile_rows, LANE), lambda i: (i, 0))],
            out_specs=pl.BlockSpec((1, 1, 1), lambda i: (i, 0, 0))),
        compiler_params=pltpu.CompilerParams(
            dimension_semantics=("parallel",)),
    )(x2, r2)
    return jnp.sum(partials)


# --------------------------------------------------------------------------
# Kernel 2: per-batch KL of a diagonal Gaussian vs N(0, I), reading the raw
# posterior parameter tensor (mean || logvar along channels).  The mean and
# logvar halves are selected purely by BlockSpec index_maps; clip + exp run
# inside the kernel.
# --------------------------------------------------------------------------
def _kl_kernel(mean_ref, logvar_ref, kl_ref):
    m = mean_ref[...]
    lv = jnp.clip(logvar_ref[...], -30.0, 20.0)
    val = 0.5 * jnp.sum(m * m + jnp.exp(lv) - 1.0 - lv)
    kl_ref[...] = jnp.reshape(val, (1, 1, 1))


def kl_per_batch(parameters):
    """Per-batch KL(N(mean, exp(logvar)) || N(0, I)) from the raw posterior
    parameters (NCHW, channels = 2 * latent_C = mean || logvar)."""
    B = parameters.shape[0]
    assert parameters.shape[1] % 2 == 0, "channels must be 2 * latent_C"
    p = parameters.astype(jnp.float32).reshape(B, 2, -1)   # free reshape
    L = p.shape[-1]

    lane_pad = (-L) % LANE
    if lane_pad:
        # Padded zeros contribute 0 to the KL (0^2 + exp(0) - 1 - 0 = 0).
        p = jnp.pad(p, ((0, 0), (0, 0), (0, lane_pad)))
    rows = (L + lane_pad) // LANE
    p4 = p.reshape(B, 2, rows, LANE)

    # TODO(synk): for very large latents, tile `rows` with a second
    # ("arbitrary") grid axis so 2 inputs x 2 buffers stays within v7x's
    # 32 MiB default scoped VMEM; typical VAE latents are far below that.
    out = pl.pallas_call(
        _kl_kernel,
        out_shape=jax.ShapeDtypeStruct((B, 1, 1), jnp.float32),
        grid_spec=pltpu.PrefetchScalarGridSpec(
            num_scalar_prefetch=0,
            grid=(B,),
            in_specs=[pl.BlockSpec((1, 1, rows, LANE), lambda b: (b, 0, 0, 0)),
                      pl.BlockSpec((1, 1, rows, LANE), lambda b: (b, 1, 0, 0))],
            out_specs=pl.BlockSpec((1, 1, 1), lambda b: (b, 0, 0))),
        compiler_params=pltpu.CompilerParams(
            dimension_semantics=("parallel",)),
    )(p4, p4)
    return out[:, 0, 0]


# --------------------------------------------------------------------------
# Python-side module equivalents (glue only; hot path is in the kernels).
# --------------------------------------------------------------------------
class DiagonalGaussianDistribution:
    """Minimal JAX port of ldm's DiagonalGaussianDistribution (kl() only).

    The Pallas KL path consumes the raw `parameters` tensor directly; mean /
    logvar / var are only materialized lazily if a caller asks for them.
    """

    def __init__(self, parameters):
        self.parameters = jnp.asarray(parameters)

    @property
    def mean(self):
        return jnp.split(self.parameters.astype(jnp.float32), 2, axis=1)[0]

    @property
    def logvar(self):
        lv = jnp.split(self.parameters.astype(jnp.float32), 2, axis=1)[1]
        return jnp.clip(lv, -30.0, 20.0)

    @property
    def var(self):
        return jnp.exp(self.logvar)

    def kl(self):
        return kl_per_batch(self.parameters)   # shape (B,)


class GaussianLoss:
    def __init__(self, logvar_init=0.0, kl_weight=1.0):
        self.kl_weight = kl_weight
        # matches nn.Parameter(torch.ones(()) * logvar_init)
        self.logvar = jnp.asarray(logvar_init, dtype=jnp.float32)

    def __call__(self, inputs, reconstructions, posteriors, split='train',
                 **kwargs):
        B = inputs.shape[0]
        numel = inputs.size

        rec_sum = rec_abs_sum(inputs, reconstructions)

        # logvar is a scalar parameter, so the elementwise NLL sum folds:
        #   sum(|x-r| / exp(lv) + lv) = exp(-lv) * sum|x-r| + lv * numel
        lv = self.logvar
        nll_sum = rec_sum * jnp.exp(-lv) + lv * numel
        weighted_nll_loss = nll_sum / B
        nll_loss = nll_sum / B

        kl = posteriors.kl()
        kl_loss = jnp.sum(kl) / kl.shape[0]

        loss = weighted_nll_loss + self.kl_weight * kl_loss

        # TODO(synk): .clone()/.detach() are no-ops for pure JAX values.
        log = {
            f'{split}/total_loss': loss,
            f'{split}/logvar': self.logvar,
            f'{split}/kl_loss': kl_loss,
            f'{split}/nll_loss': nll_loss,
            f'{split}/rec_loss': rec_sum / numel,
        }
        return loss, log


if __name__ == "__main__":
    key = jax.random.PRNGKey(0)
    k1, k2, k3, k4, k5 = jax.random.split(key, 5)

    # inputs / reconstructions: NCHW
    inputs = jax.random.normal(k1, (2, 4, 16, 16), dtype=jnp.float32)
    reconstructions = jax.random.normal(k2, (2, 4, 16, 16), dtype=jnp.float32)
    # posterior parameters: NCHW with 2*latent_C channels (mean || logvar)
    post_params = 0.5 * jax.random.normal(k3, (2, 8, 8, 8), dtype=jnp.float32)

    posteriors = DiagonalGaussianDistribution(post_params)
    loss_module = GaussianLoss(logvar_init=0.3, kl_weight=1.0)

    loss, log = loss_module(inputs, reconstructions, posteriors, split='train')
    jax.block_until_ready(loss)
    jax.block_until_ready(log)

    # pure-JAX reference (mirrors the PyTorch math exactly)
    rec_ref = jnp.abs(inputs - reconstructions)
    nll_ref = rec_ref / jnp.exp(loss_module.logvar) + loss_module.logvar
    wnll_ref = jnp.sum(nll_ref) / inputs.shape[0]
    mean_ref, logvar_ref = jnp.split(post_params, 2, axis=1)
    logvar_ref = jnp.clip(logvar_ref, -30.0, 20.0)
    kl_b_ref = 0.5 * jnp.sum(mean_ref ** 2 + jnp.exp(logvar_ref) - 1.0
                             - logvar_ref, axis=(1, 2, 3))
    kl_ref = jnp.sum(kl_b_ref) / kl_b_ref.shape[0]
    loss_ref = wnll_ref + loss_module.kl_weight * kl_ref

    np.testing.assert_allclose(np.asarray(loss), np.asarray(loss_ref),
                               rtol=1e-5, atol=1e-5)
    np.testing.assert_allclose(np.asarray(log['train/kl_loss']),
                               np.asarray(kl_ref), rtol=1e-5, atol=1e-5)
    np.testing.assert_allclose(np.asarray(log['train/nll_loss']),
                               np.asarray(wnll_ref), rtol=1e-5, atol=1e-5)
    np.testing.assert_allclose(np.asarray(log['train/rec_loss']),
                               np.asarray(jnp.mean(rec_ref)),
                               rtol=1e-5, atol=1e-5)

    # exercise kernel 1's multi-block + ragged-tail (masked) path
    xa = jax.random.normal(k4, (2, 3, 24, 40), dtype=jnp.float32)  # 45 rows
    xb = jax.random.normal(k5, (2, 3, 24, 40), dtype=jnp.float32)
    s = rec_abs_sum(xa, xb, max_tile_rows=8)       # 6 blocks, partial last
    jax.block_until_ready(s)
    np.testing.assert_allclose(np.asarray(s),
                               np.asarray(jnp.sum(jnp.abs(xa - xb))),
                               rtol=1e-5, atol=1e-5)

    print("KERNEL_OK")
</pallas_src>

<mosaic_0001>
module attributes {stable_mosaic.version = 11 : i64} {
  func.func @_abs_diff_partial_kernel(%arg0: i32, %arg1: memref<16x128xf32, #tpu.memory_space<vmem>>, %arg2: memref<16x128xf32, #tpu.memory_space<vmem>>, %arg3: memref<1x1x1xf32, #tpu.memory_space<vmem>>) attributes {dimension_semantics = [#tpu.dimension_semantics<parallel>], iteration_bounds = array<i64: 1>, scalar_prefetch = 0 : i64, scratch_operands = 0 : i64, tpu.core_type = #tpu.core_type<tc>, window_params = [{transform_indices = @transform_0, window_bounds = array<i64: 16, 128>}, {transform_indices = @transform_1, window_bounds = array<i64: 16, 128>}, {transform_indices = @transform_2, window_bounds = array<i64: 1, 1, 1>}]} {
    %c0 = arith.constant 0 : index
    %c0_0 = arith.constant 0 : index
    %0 = vector.load %arg1[%c0, %c0_0] : memref<16x128xf32, #tpu.memory_space<vmem>>, vector<16x128xf32>
    %c0_1 = arith.constant 0 : index
    %c0_2 = arith.constant 0 : index
    %1 = vector.load %arg2[%c0_1, %c0_2] : memref<16x128xf32, #tpu.memory_space<vmem>>, vector<16x128xf32>
    %2 = arith.subf %0, %1 : vector<16x128xf32>
    %3 = math.absf %2 : vector<16x128xf32>
    %4 = vector.shape_cast %3 : vector<16x128xf32> to vector<1x16x128xf32>
    %cst = arith.constant dense<0.000000e+00> : vector<1xf32>
    %5 = vector.multi_reduction <add>, %4, %cst [1, 2] : vector<1x16x128xf32> to vector<1xf32>
    %6 = vector.shape_cast %5 : vector<1xf32> to vector<1x1x1xf32>
    %7 = vector.extract %6[0, 0, 0] : f32 from vector<1x1x1xf32>
    %8 = vector.broadcast %7 : f32 to vector<1x1x1xf32>
    %c0_3 = arith.constant 0 : index
    %c0_4 = arith.constant 0 : index
    %c0_5 = arith.constant 0 : index
    %9 = vector.load %arg3[%c0_3, %c0_4, %c0_5] : memref<1x1x1xf32, #tpu.memory_space<vmem>>, vector<1x1x1xf32>
    tpu.vector_store %arg3[%c0_3, %c0_4, %c0_5], %8 {strides = array<i32>} : memref<1x1x1xf32, #tpu.memory_space<vmem>>, vector<1x1x1xf32>,
    return
  }
  func.func @transform_0(%arg0: i32) -> (i32, i32) {
    %c0_i32 = arith.constant 0 : i32
    %c0_i32_0 = arith.constant 0 : i32
    return %arg0, %c0_i32 : i32, i32
  }
  func.func @transform_1(%arg0: i32) -> (i32, i32) {
    %c0_i32 = arith.constant 0 : i32
    %c0_i32_0 = arith.constant 0 : i32
    return %arg0, %c0_i32 : i32, i32
  }
  func.func @transform_2(%arg0: i32) -> (i32, i32, i32) {
    %c0_i32 = arith.constant 0 : i32
    %c0_i32_0 = arith.constant 0 : i32
    %c0_i32_1 = arith.constant 0 : i32
    return %arg0, %c0_i32, %c0_i32_0 : i32, i32, i32
  }
}

</mosaic_0001>

<bundles_post_ra>
// kernel: tpu_custom_call.1
= control target key start
LH: loop header
LB: loop body
LE: loop exit
PB: predicated region body
PF: predicated region fallthrough
CT: control target
= control target key end

     0   :  { %7 = vsyncpa [#allocation3], 0  ;;  %s179_s0 = inlined_call_operand.hbm [shape: f32[16,128], index: 0, kind: input, shape index: {}]   ;;  %s180_s1 = inlined_call_operand.hbm [shape: f32[16,128], index: 1, kind: input, shape index: {}]   ;;  %s181_s2 = inlined_call_operand.hbm [shape: f32[1,1,1], index: 2, kind: output, shape index: {}]  }
   0x1   :  { %8 = vsyncpa [#allocation6], 0 }
   0x2   :  { %9 = vsyncpa [#allocation4], 0  ;;  %s150_s9 = smov [#allocation2]  }
   0x3   :  { %s15_s10 = sshll.u32 %s150_s9, 4  ;;  %s16_s10 = int_to_ptr.vmem [resolvable:$true] %s15_s10 }
   0x4   :  { %s92_s11 = scalar_lea.vmem %s16_s10, 256  ;;  %p97_p1 = scmp.lt.s32.totalorder %s16_s10, %s16_s10 }
   0x5   :  { %p93_p0 = scmp.ne.s32.totalorder %s16_s10, %s92_s11  ;;  %p98_p2 = scmp.lt.s32.totalorder %s92_s11, %s92_s11 }
   0x7   :  { %p99_p3 = por %p98_p2, %p97_p1 }
   0x9   :  { %p100_p4 = pnand %p99_p3, %p93_p0 }
   0xb   :  { %103 = shalt.err (!%p100_p4)
}
   0xc   :  { %s151_s12 = smov 128   ;;  %s152_s13 = smov 8  }
   0xd   :  { %21 = dma.hbm_to_vmem [thread:$0]  %s179_s0, 256, %s16_s10, [#allocation3], %s151_s12, %s151_s12, %s152_s13  }
   0xe   :  { %s153_s16 = smov [#allocation5]  }
   0xf   :  { %s27_s17 = sshll.u32 %s153_s16, 4  ;;  %s28_s17 = int_to_ptr.vmem [resolvable:$true] %s27_s17 }
  0x10   :  { %s112_s18 = scalar_lea.vmem %s28_s17, 256  ;;  %p117_p6 = scmp.lt.s32.totalorder %s28_s17, %s28_s17 }
  0x11   :  { %p113_p5 = scmp.ne.s32.totalorder %s28_s17, %s112_s18  ;;  %p118_p7 = scmp.lt.s32.totalorder %s112_s18, %s112_s18 }
  0x13   :  { %p119_p8 = por %p118_p7, %p117_p6 }
  0x15   :  { %p120_p9 = pnand %p119_p8, %p113_p5 }
  0x17   :  { %123 = shalt.err (!%p120_p9)
}
  0x18   :  { %33 = dma.hbm_to_vmem [thread:$0]  %s180_s1, 256, %s28_s17, [#allocation6], %s151_s12, %s151_s12, %s152_s13  }
  0x19   :  { %144 = dma.done.wait [#allocation3], 256  }
  0x1a   :  { %145 = vsyncadd [#allocation3], 4294967040 }
  0x1b   :  { %146 = dma.done.wait [#allocation6], 256  }
  0x1c   :  { %147 = vsyncadd [#allocation6], 4294967040  ;;  %v40_v0 = vld [vmem:[#allocation2] sm:$0xff]  ;;  %v41_v1 = vld [vmem:[#allocation2 + $0x8] sm:$0xff]  ;;  %s154_s0 = smov [#allocation7]   ;;  %vm59_vm0 = vcmask 0  }
  0x1d   :  { %v42_v2 = vld [vmem:[#allocation5] sm:$0xff]  ;;  %v43_v3 = vld [vmem:[#allocation5 + $0x8] sm:$0xff]  ;;  %s67_s1 = sshll.u32 %s154_s0, 4  ;;  %s68_s1 = int_to_ptr.vmem [resolvable:$true] %s67_s1 }
  0x1e   :  { %v44_v4 = vsub.f32 %v40_v0, %v42_v2  ;;  %v45_v5 = vsub.f32 %v41_v1, %v43_v3  ;;  %s124_s22 = scalar_lea.vmem %s68_s1, 16  ;;  %s128_s23 = scalar_lea.vmem %s68_s1, 32 }
  0x1f   :  { %p125_p10 = scmp.ne.s32.totalorder %s68_s1, %s124_s22  ;;  %p129_p11 = scmp.lt.s32.totalorder %s68_s1, %s68_s1 }
  0x20   :  { %v46_v6 = vand.u32 2147483647, %v44_v4  ;;  %v47_v7 = vand.u32 2147483647, %v45_v5  ;;  %p130_p12 = scmp.lt.s32.totalorder %s128_s23, %s124_s22 }
  0x22   :  { %v48_v8 = vadd.f32 %v47_v7, %v46_v6  ;;  %p131_p13 = por %p130_p12, %p129_p11 }
  0x24   :  { %49 = vadd.xlane.f32.xlu0 %v48_v8  ;;  %p132_p0 = pnand %p131_p13, %p125_p10 }
  0xad   :  { %v50_v9 = vpop.xlane.xlu0 %49 }
  0xae   :  { %v51_v10 = vrot.slane %v50_v9, 4 }
  0xb0   :  { %v52_v11 = vadd.f32 %v51_v10, %v50_v9 }
  0xb2   :  { %v53_v12 = vrot.slane %v52_v11, 2 }
  0xb4   :  { %v54_v13 = vadd.f32 %v53_v12, %v52_v11 }
  0xb6   :  { %v55_v14 = vrot.slane %v54_v13, 1 }
  0xb8   :  { %v56_v15 = vadd.f32 %v55_v14, %v54_v13 }
  0xba   :  { %77 = vpush %v56_v15 }
  0xeb   :  { %s78_s21 = spop %77 }
  0xec   :  { %v58_v16 = vstv %s78_s21 }
  0xed   :  { %60 = vst.msk [vmem:[#allocation7] sm:$0x1] %vm59_vm0, %v58_v16 }
  0xee   :  { %135 = shalt.err (!%p132_p0)
}
  0xef   :  { %70 = dma.vmem_to_hbm [thread:$0]  %s68_s1, 16, %s181_s2, [#allocation4]  }
  0xf0   :  { %148 = dma.done.wait [#allocation4], 16  }
  0xf1   :  { %149 = vsyncadd [#allocation4], 4294967280 }
  0xf2   :  { %74 = vsyncpa [#allocation3], 1 }
  0xf3   :  { %75 = vsyncpa [#allocation6], 1 }
  0xf4   :  { %76 = vsyncpa [#allocation4], 1 }

</bundles_post_ra>
